<compile_context>
chip_gen: v5e
topology: v5e:2x2
jax: 0.10.0
libtpu: 0.0.40
codegen_flags: <defaults>
</compile_context>

<pallas_src>
import functools

import jax
import jax.numpy as jnp
from jax.experimental import pallas as pl
from jax.experimental.pallas import tpu as pltpu


DEFAULT_ROW_TILE = 128          # MXU-aligned on v5e/v6e/v7x; raise to 256-512 for large N.
COMPUTE_DTYPE = jnp.bfloat16    # MXU-native matmul dtype; accumulation stays f32.


# ----------------------------- kernels --------------------------------------

def _onehot_rows(ids, v, dtype):
    # ids: (tm, 1) int32 -> exact one-hot (tm, v) in `dtype`.
    tm = ids.shape[0]
    col = jax.lax.broadcasted_iota(jnp.int32, (tm, v), 1)
    return (col == ids).astype(dtype)


def _row_logits(ids_ref, tbl_ref):
    # Single fused MXU matmul: one-hot row select from the precomputed logits
    # table L = emb @ W + b.  K = N = V, so MXU columns are fully used.
    v = tbl_ref.shape[0]
    onehot = _onehot_rows(ids_ref[...], v, tbl_ref.dtype)
    return jnp.dot(onehot, tbl_ref[...], preferred_element_type=jnp.float32)  # (tm, V) f32


def _logits_kernel(ids_ref, tbl_ref, o_ref):
    o_ref[...] = _row_logits(ids_ref, tbl_ref)


def _pred_kernel(ids_ref, tbl_ref, o_ref):
    logits = _row_logits(ids_ref, tbl_ref)
    m = jnp.max(logits, axis=-1, keepdims=True)
    e = jnp.exp(logits - m)
    denom = jnp.sum(e, axis=-1, keepdims=True)
    # exact f32 division (approx reciprocal violated the sum-to-one tolerance)
    o_ref[...] = e / denom


def _loss_partial_kernel(ids_ref, tgt_ref, tbl_ref, o_ref):
    # Per-tile partial NLL sum, lane-dense (1, 1, V).  Row axis is "parallel":
    # no cross-step accumulator, so v7x can shard tiles across both TCs; the
    # tiny final reduction is done in XLA.
    v = tbl_ref.shape[0]
    logits = _row_logits(ids_ref, tbl_ref)
    m = jnp.max(logits, axis=-1, keepdims=True)
    shifted = logits - m
    lse = jnp.log(jnp.sum(jnp.exp(shifted), axis=-1, keepdims=True))
    logp = shifted - lse                                          # (tm, V)
    # padded target rows are id = -1 -> one-hot is all-zero -> contribute 0
    tgt_onehot = _onehot_rows(tgt_ref[...], v, jnp.float32)       # (tm, V)
    partial = -jnp.sum(tgt_onehot * logp, axis=0, keepdims=True)  # (1, V)
    o_ref[...] = partial[None]                                    # (1, 1, V)


# ----------------------------- pallas_call wrappers --------------------------

def _resident_spec(shape):
    # whole-array block, same tile every grid step (stays resident in VMEM)
    return pl.BlockSpec(shape, lambda i: tuple(0 for _ in shape))


def _call_rowwise(kernel, ids2d, table, row_tile):
    n_pad = ids2d.shape[0]
    v = table.shape[0]
    grid = (n_pad // row_tile,)
    return pl.pallas_call(
        kernel,
        out_shape=jax.ShapeDtypeStruct((n_pad, v), jnp.float32),
        grid_spec=pltpu.PrefetchScalarGridSpec(
            num_scalar_prefetch=0,
            grid=grid,
            in_specs=[
                pl.BlockSpec((row_tile, 1), lambda i: (i, 0)),   # token ids (row tile)
                _resident_spec((v, v)),                          # fused logits table
            ],
            out_specs=pl.BlockSpec((row_tile, v), lambda i: (i, 0)),  # lane-dense
        ),
        compiler_params=pltpu.CompilerParams(
            dimension_semantics=("parallel",)),   # shard rows across TCs (v7x) + pipeline
    )(ids2d, table)


def _call_loss_partials(ids2d, tgt2d, table, row_tile):
    n_pad = ids2d.shape[0]
    v = table.shape[0]
    n_tiles = n_pad // row_tile
    return pl.pallas_call(
        _loss_partial_kernel,
        out_shape=jax.ShapeDtypeStruct((n_tiles, 1, v), jnp.float32),
        grid_spec=pltpu.PrefetchScalarGridSpec(
            num_scalar_prefetch=0,
            grid=(n_tiles,),
            in_specs=[
                pl.BlockSpec((row_tile, 1), lambda i: (i, 0)),   # current ids
                pl.BlockSpec((row_tile, 1), lambda i: (i, 0)),   # target ids
                _resident_spec((v, v)),                          # fused logits table
            ],
            out_specs=pl.BlockSpec((1, 1, v), lambda i: (i, 0, 0)),   # per-tile partials
        ),
        compiler_params=pltpu.CompilerParams(
            dimension_semantics=("parallel",)),   # per-tile partials -> no serialization
    )(ids2d, tgt2d, table)


# ----------------------------- jitted end-to-end graphs ----------------------

def _pad_rows(x2d, tile, pad_value):
    n = x2d.shape[0]
    n_pad = pl.cdiv(n, tile) * tile
    if n_pad != n:
        x2d = jnp.pad(x2d, ((0, n_pad - n), (0, 0)), constant_values=pad_value)
    return x2d


@functools.partial(jax.jit, static_argnames=("row_tile",))
def _forward_impl(table, ids, row_tile=DEFAULT_ROW_TILE):
    bsz, seq = ids.shape
    n = bsz * seq
    v = table.shape[0]
    ids2d = _pad_rows(ids.reshape(n, 1).astype(jnp.int32), row_tile, 0)
    logits = _call_rowwise(_logits_kernel, ids2d, table, row_tile)
    return logits[:n].reshape(bsz, seq, v)


@functools.partial(jax.jit, static_argnames=("row_tile",))
def _pred_impl(table, ids, row_tile=DEFAULT_ROW_TILE):
    bsz, seq = ids.shape
    n = bsz * seq
    v = table.shape[0]
    ids2d = _pad_rows(ids.reshape(n, 1).astype(jnp.int32), row_tile, 0)
    probs = _call_rowwise(_pred_kernel, ids2d, table, row_tile)
    return probs[:n].reshape(bsz, seq, v)


@functools.partial(jax.jit, static_argnames=("row_tile",))
def _loss_impl(table, cur_ids, next_ids, row_tile=DEFAULT_ROW_TILE):
    bsz, seq = cur_ids.shape
    n = bsz * seq
    ids2d = _pad_rows(cur_ids.reshape(n, 1).astype(jnp.int32), row_tile, 0)
    tgt2d = _pad_rows(next_ids.reshape(n, 1).astype(jnp.int32), row_tile, -1)  # -1 => masked
    partials = _call_loss_partials(ids2d, tgt2d, table, row_tile)
    return (jnp.sum(partials) / jnp.float32(n)).reshape(1)


# ----------------------------- model ----------------------------------------

class PallasBaseModel:
    """Minimal concrete realization of BaseModel's interface on TPU Pallas."""

    model_name = "base"

    def __init__(self, vocab_size: int = 128, d_model: int = 32,
                 row_tile: int = DEFAULT_ROW_TILE):
        self.vocab_size = vocab_size
        self.d_model = d_model
        self.row_tile = row_tile
        self.params_init()

    def params_init(self):
        # deterministic init (matches BaseModel.params_init contract)
        key = jax.random.PRNGKey(0)
        k_emb, k_w = jax.random.split(key)
        self.emb = 0.02 * jax.random.normal(
            k_emb, (self.vocab_size, self.d_model), jnp.float32)
        self.w = 0.02 * jax.random.normal(
            k_w, (self.d_model, self.vocab_size), jnp.float32)
        self.b = jnp.zeros((1, self.vocab_size), jnp.float32)
        self._refresh_fused_table()

    def _refresh_fused_table(self):
        # L = emb @ W + b, computed ONCE per weight update in f32 (HIGHEST),
        # then cached in bf16.  Per-token kernels are a single onehot @ L matmul.
        # TODO(synk): at production vocab sizes the (V, V) table no longer fits
        # VMEM; switch to scalar-prefetch row gather + vocab-tiled projection.
        logits_table = jnp.dot(self.emb, self.w,
                               preferred_element_type=jnp.float32,
                               precision=jax.lax.Precision.HIGHEST) + self.b
        self.logits_table = logits_table.astype(COMPUTE_DTYPE)

    # TODO(synk): add_CLI_args is argparse plumbing with no tensor/Pallas equivalent.

    def forward(self, batch_cur_tkids, batch_prev_states=None):
        logits = _forward_impl(self.logits_table, batch_cur_tkids,
                               row_tile=self.row_tile)
        return logits, batch_prev_states

    def pred(self, batch_cur_tkids, batch_prev_states=None):
        probs = _pred_impl(self.logits_table, batch_cur_tkids,
                           row_tile=self.row_tile)
        return probs, batch_prev_states

    def cal_loss(self, batch_cur_tkids, batch_next_tkids, batch_prev_states=None):
        loss = _loss_impl(self.logits_table, batch_cur_tkids, batch_next_tkids,
                          row_tile=self.row_tile)
        return loss, batch_prev_states   # shape (1,), dtype float32


# ----------------------------- main -----------------------------------------

if __name__ == "__main__":
    B, S, V, D = 2, 8, 128, 32
    model = PallasBaseModel(vocab_size=V, d_model=D)

    key = jax.random.PRNGKey(0)
    k_cur, k_nxt = jax.random.split(key)
    cur = jax.random.randint(k_cur, (B, S), 0, V, dtype=jnp.int32)
    nxt = jax.random.randint(k_nxt, (B, S), 0, V, dtype=jnp.int32)

    logits, _ = model.forward(cur)
    probs, _ = model.pred(cur)
    loss, _ = model.cal_loss(cur, nxt)

    jax.block_until_ready((logits, probs, loss))

    # pure-JAX f32 reference (kernel uses a bf16 fused table -> loosened tolerances)
    h_ref = jnp.take(model.emb, cur, axis=0).reshape(B * S, D)
    logits_ref = (h_ref @ model.w + model.b).reshape(B, S, V)
    probs_ref = jax.nn.softmax(logits_ref, axis=-1)
    logp_ref = jax.nn.log_softmax(logits_ref, axis=-1)
    loss_ref = -jnp.mean(
        jnp.take_along_axis(logp_ref, nxt[..., None], axis=-1))

    assert logits.shape == (B, S, V) and logits.dtype == jnp.float32
    assert probs.shape == (B, S, V) and probs.dtype == jnp.float32
    assert loss.shape == (1,) and loss.dtype == jnp.float32
    assert jnp.allclose(logits, logits_ref, atol=1e-3)
    assert jnp.allclose(probs, probs_ref, atol=1e-4)
    assert jnp.allclose(jnp.sum(probs, axis=-1), 1.0, atol=1e-3)
    assert jnp.allclose(loss[0], loss_ref, atol=1e-3)

    print("KERNEL_OK")
</pallas_src>

<mosaic_0001>
module attributes {stable_mosaic.version = 11 : i64} {
  func.func @_logits_kernel(%arg0: i32, %arg1: memref<128x1xi32, #tpu.memory_space<vmem>>, %arg2: memref<128x128xbf16, #tpu.memory_space<vmem>>, %arg3: memref<128x128xf32, #tpu.memory_space<vmem>>) attributes {dimension_semantics = [#tpu.dimension_semantics<parallel>], iteration_bounds = array<i64: 1>, scalar_prefetch = 0 : i64, scratch_operands = 0 : i64, tpu.core_type = #tpu.core_type<tc>, window_params = [{transform_indices = @transform_0, window_bounds = array<i64: 128, 1>}, {pipeline_mode = #tpu.pipeline_mode<synchronous>, transform_indices = @transform_1, window_bounds = array<i64: 128, 128>}, {transform_indices = @transform_2, window_bounds = array<i64: 128, 128>}]} {
    %c0 = arith.constant 0 : index
    %c0_0 = arith.constant 0 : index
    %0 = vector.load %arg1[%c0, %c0_0] : memref<128x1xi32, #tpu.memory_space<vmem>>, vector<128x1xi32>
    %1 = tpu.iota {dimensions = array<i32: 1>} : vector<128x128xi32>
    %2 = vector.broadcast %0 : vector<128x1xi32> to vector<128x128xi32>
    %3 = arith.cmpi eq, %1, %2 : vector<128x128xi32>
    %4 = arith.extui %3 : vector<128x128xi1> to vector<128x128xi32>
    %5 = arith.sitofp %4 : vector<128x128xi32> to vector<128x128xf32>
    %6 = arith.truncf %5 : vector<128x128xf32> to vector<128x128xbf16>
    %c0_1 = arith.constant 0 : index
    %c0_2 = arith.constant 0 : index
    %7 = vector.load %arg2[%c0_1, %c0_2] : memref<128x128xbf16, #tpu.memory_space<vmem>>, vector<128x128xbf16>
    %cst = arith.constant dense<0.000000e+00> : vector<128x128xf32>
    %8 = tpu.matmul %6, %7, %cst {dimension_numbers = #tpu.dot_dimension_numbers<[1], [0], [0], [1], [0, 0, 1, 1], [], []>} : vector<128x128xbf16>, vector<128x128xbf16>, vector<128x128xf32> -> vector<128x128xf32>
    %c0_3 = arith.constant 0 : index
    %c0_4 = arith.constant 0 : index
    %9 = vector.load %arg3[%c0_3, %c0_4] : memref<128x128xf32, #tpu.memory_space<vmem>>, vector<128x128xf32>
    tpu.vector_store %arg3[%c0_3, %c0_4], %8 {strides = array<i32>} : memref<128x128xf32, #tpu.memory_space<vmem>>, vector<128x128xf32>,
    return
  }
  func.func @transform_0(%arg0: i32) -> (i32, i32) {
    %c0_i32 = arith.constant 0 : i32
    %c0_i32_0 = arith.constant 0 : i32
    return %arg0, %c0_i32 : i32, i32
  }
  func.func @transform_1(%arg0: i32) -> (i32, i32) {
    %c0_i32 = arith.constant 0 : i32
    %c0_i32_0 = arith.constant 0 : i32
    %c0_i32_1 = arith.constant 0 : i32
    return %c0_i32, %c0_i32_0 : i32, i32
  }
  func.func @transform_2(%arg0: i32) -> (i32, i32) {
    %c0_i32 = arith.constant 0 : i32
    %c0_i32_0 = arith.constant 0 : i32
    return %arg0, %c0_i32 : i32, i32
  }
}

</mosaic_0001>

<bundles_post_ra>
// kernel: _forward_impl.1
= control target key start
LH: loop header
LB: loop body
LE: loop exit
PB: predicated region body
PF: predicated region fallthrough
CT: control target
= control target key end

     0   :  { %v367_v0 = vmov 0   ;;  %v27_v25 = vlaneseq  ;;  %v368_v29 = vmov 1.0|1.0   ;;  %s504_s0 = inlined_call_operand.vmem [shape: s32[128,1], index: 0, kind: input, shape index: {}]   ;;  %s505_s1 = inlined_call_operand.vmem [shape: bf16[128,128], index: 1, kind: input, shape index: {}]   ;;  %s506_s2 = inlined_call_operand.vmem [shape: f32[128,128], index: 2, kind: output, shape index: {}]  }
   0x1   :  { %366 = vset.pattern.permute.xlu2 %v367_v0  ;;  %365 = vset.pattern.permute.xlu1 %v367_v0  ;;  %v23_v1 = vld [vmem:[%s504_s0 + $0x60] sm:$0xff]  ;;  %v24_v4 = vld [vmem:[%s504_s0 + $0x68] sm:$0xff]  ;;  %v337_v7 = vld [vmem:[%s505_s1 + $0x38] sm:$0xff] }
   0x2   :  { %v19_v2 = vld [vmem:[%s504_s0 + $0x40] sm:$0xff]  ;;  %364 = vset.pattern.permute.xlu0 %v367_v0  ;;  %66 = vperm.xlu1 %365, %v23_v1   ;;  %v20_v5 = vld [vmem:[%s504_s0 + $0x48] sm:$0xff]  ;;  %v336_v8 = vld [vmem:[%s505_s1 + $0x30] sm:$0xff]  ;;  %v28_v27 = vand.u32 127, %v27_v25 }
   0x3   :  { %v11_v3 = vld [vmem:[%s504_s0] sm:$0xff]  ;;  %54 = vperm.xlu0 %364, %v19_v2   ;;  %v12_v6 = vld [vmem:[%s504_s0 + $0x8] sm:$0xff]  ;;  %197 = vmatpush.bf16.msra.mxu0 %v337_v7  ;;  %v21_v11 = vld [vmem:[%s504_s0 + $0x50] sm:$0xff] }
   0x4   :  { %30 = vperm.xlu2 %366, %v11_v3   ;;  %339 = vmatpush.bf16.msra.mxu2 %v337_v7  ;;  %v16_v9 = vld [vmem:[%s504_s0 + $0x28] sm:$0xff]  ;;  %v15_v10 = vld [vmem:[%s504_s0 + $0x20] sm:$0xff]  ;;  %v25_v12 = vld [vmem:[%s504_s0 + $0x70] sm:$0xff] }
   0x5   :  { %340 = vmatpush.bf16.msra.mxu3 %v337_v7  ;;  %338 = vmatpush.bf16.msra.mxu1 %v337_v7  ;;  %v22_v13 = vld [vmem:[%s504_s0 + $0x58] sm:$0xff]  ;;  %v13_v16 = vld [vmem:[%s504_s0 + $0x10] sm:$0xff]  ;;  %v335_v19 = vld [vmem:[%s505_s1 + $0x28] sm:$0xff] }
   0x6   :  { %v26_v14 = vld [vmem:[%s504_s0 + $0x78] sm:$0xff]  ;;  %v17_v17 = vld [vmem:[%s504_s0 + $0x30] sm:$0xff]  ;;  %v334_v20 = vld [vmem:[%s505_s1 + $0x20] sm:$0xff] }
   0x7   :  { %198 = vmatpush.bf16.msra.mxu0 %v336_v8  ;;  %v14_v15 = vld [vmem:[%s504_s0 + $0x18] sm:$0xff]  ;;  %v332_v22 = vld [vmem:[%s505_s1 + $0x10] sm:$0xff]  ;;  %v331_v23 = vld [vmem:[%s505_s1 + $0x8] sm:$0xff] }
   0x8   :  { %342 = vmatpush.bf16.msra.mxu2 %v336_v8  ;;  %v18_v18 = vld [vmem:[%s504_s0 + $0x38] sm:$0xff]  ;;  %v330_v24 = vld [vmem:[%s505_s1] sm:$0xff] }
   0x9   :  { %343 = vmatpush.bf16.msra.mxu3 %v336_v8  ;;  %341 = vmatpush.bf16.msra.mxu1 %v336_v8  ;;  %v333_v21 = vld [vmem:[%s505_s1 + $0x18] sm:$0xff] }
   0xa   :  { %69 = vperm.xlu1 %365, %v24_v4  }
   0xb   :  { %57 = vperm.xlu0 %364, %v20_v5   ;;  %199 = vmatpush.bf16.msra.mxu0 %v335_v19 }
   0xc   :  { %33 = vperm.xlu2 %366, %v12_v6   ;;  %345 = vmatpush.bf16.msra.mxu2 %v335_v19 }
   0xd   :  { %346 = vmatpush.bf16.msra.mxu3 %v335_v19  ;;  %344 = vmatpush.bf16.msra.mxu1 %v335_v19 }
   0xf   :  { %200 = vmatpush.bf16.msra.mxu0 %v334_v20 }
  0x10   :  { %348 = vmatpush.bf16.msra.mxu2 %v334_v20 }
  0x11   :  { %349 = vmatpush.bf16.msra.mxu3 %v334_v20  ;;  %347 = vmatpush.bf16.msra.mxu1 %v334_v20 }
  0x12   :  { %45 = vperm.xlu1 %365, %v16_v9  }
  0x13   :  { %42 = vperm.xlu0 %364, %v15_v10   ;;  %201 = vmatpush.bf16.msra.mxu0 %v333_v21 }
  0x14   :  { %60 = vperm.xlu2 %366, %v21_v11   ;;  %351 = vmatpush.bf16.msra.mxu2 %v333_v21 }
  0x15   :  { %352 = vmatpush.bf16.msra.mxu3 %v333_v21  ;;  %350 = vmatpush.bf16.msra.mxu1 %v333_v21 }
  0x17   :  { %202 = vmatpush.bf16.msra.mxu0 %v332_v22 }
  0x18   :  { %354 = vmatpush.bf16.msra.mxu2 %v332_v22 }
  0x19   :  { %355 = vmatpush.bf16.msra.mxu3 %v332_v22  ;;  %353 = vmatpush.bf16.msra.mxu1 %v332_v22 }
  0x1a   :  { %72 = vperm.xlu1 %365, %v25_v12  }
  0x1b   :  { %63 = vperm.xlu0 %364, %v22_v13   ;;  %203 = vmatpush.bf16.msra.mxu0 %v331_v23 }
  0x1c   :  { %75 = vperm.xlu2 %366, %v26_v14   ;;  %357 = vmatpush.bf16.msra.mxu2 %v331_v23 }
  0x1d   :  { %358 = vmatpush.bf16.msra.mxu3 %v331_v23  ;;  %356 = vmatpush.bf16.msra.mxu1 %v331_v23 }
  0x1f   :  { %204 = vmatpush.bf16.msra.mxu0 %v330_v24 }
  0x20   :  { %360 = vmatpush.bf16.msra.mxu2 %v330_v24 }
  0x21   :  { %361 = vmatpush.bf16.msra.mxu3 %v330_v24  ;;  %359 = vmatpush.bf16.msra.mxu1 %v330_v24 }
  0x22   :  { %39 = vperm.xlu1 %365, %v14_v15  }
  0x23   :  { %36 = vperm.xlu0 %364, %v13_v16  }
  0x24   :  { %48 = vperm.xlu2 %366, %v17_v17  }
  0x2b   :  { %51 = vperm.xlu0 %364, %v18_v18  }
  0x5e   :  { %v31_v26 = vpop.permute.xlu2 %30 }
  0x5f   :  { %vm77_vm0 = vcmp.eq.s32.totalorder %v28_v27, %v31_v26 }
  0x66   :  { %v34_v28 = vpop.permute.xlu2 %33 }
  0x67   :  { %vm78_vm1 = vcmp.eq.s32.totalorder %v28_v27, %v34_v28 }
  0x68   :  { %vm314_vm2 = vmpackc.low %vm78_vm1, %vm77_vm0 }
  0x69   :  { %315 = vmatmul.msk.bf16.vlgmr.msra.gmra.mxu0 %vm314_vm2, %v368_v29 }
  0x6e   :  { %v61_v34 = vpop.permute.xlu2 %60 }
  0x6f   :  { %vm87_vm14 = vcmp.eq.s32.totalorder %v28_v27, %v61_v34 }
  0x74   :  { %v67_v30 = vpop.permute.xlu1 %66 }
  0x75   :  { %v55_v31 = vpop.permute.xlu0 %54  ;;  %vm89_vm3 = vcmp.eq.s32.totalorder %v28_v27, %v67_v30 }
  0x76   :  { %vm85_vm5 = vcmp.eq.s32.totalorder %v28_v27, %v55_v31  ;;  %v76_v37 = vpop.permute.xlu2 %75 }
  0x77   :  { %vm92_vm12 = vcmp.eq.s32.totalorder %v28_v27, %v76_v37 }
  0x7c   :  { %v70_v32 = vpop.permute.xlu1 %69 }
  0x7d   :  { %vm90_vm4 = vcmp.eq.s32.totalorder %v28_v27, %v70_v32  ;;  %v58_v33 = vpop.permute.xlu0 %57 }
  0x7e   :  { %vm326_vm6 = vmpackc.low %vm90_vm4, %vm89_vm3  ;;  %vm86_vm7 = vcmp.eq.s32.totalorder %v28_v27, %v58_v33  ;;  %v49_v42 = vpop.permute.xlu2 %48 }
  0x7f   :  { %vm322_vm8 = vmpackc.low %vm86_vm7, %vm85_vm5  ;;  %327 = vmatmul.msk.bf16.vlgmr.msra.gmra.mxu3 %vm326_vm6, %v368_v29  ;;  %vm83_vm5 = vcmp.eq.s32.totalorder %v28_v27, %v49_v42 }
  0x80   :  { %323 = vmatmul.msk.bf16.vlgmr.msra.gmra.mxu2 %vm322_vm8, %v368_v29 }
  0x84   :  { %v46_v35 = vpop.permute.xlu1 %45 }
  0x85   :  { %vm82_vm9 = vcmp.eq.s32.totalorder %v28_v27, %v46_v35  ;;  %v43_v36 = vpop.permute.xlu0 %42 }
  0x86   :  { %vm81_vm10 = vcmp.eq.s32.totalorder %v28_v27, %v43_v36 }
  0x87   :  { %vm318_vm11 = vmpackc.low %vm82_vm9, %vm81_vm10 }
  0x88   :  { %319 = vmatmul.msk.bf16.vlgmr.msra.gmra.mxu1 %vm318_vm11, %v368_v29 }
  0x8c   :  { %v73_v38 = vpop.permute.xlu1 %72 }
  0x8d   :  { %vm91_vm13 = vcmp.eq.s32.totalorder %v28_v27, %v73_v38  ;;  %v64_v39 = vpop.permute.xlu0 %63 }
  0x8e   :  { %vm328_vm15 = vmpackc.low %vm92_vm12, %vm91_vm13  ;;  %vm88_vm0 = vcmp.eq.s32.totalorder %v28_v27, %v64_v39 }
  0x8f   :  { %vm324_vm1 = vmpackc.low %vm88_vm0, %vm87_vm14  ;;  %329 = vmatmul.msk.bf16.gmra.mxu3 %vm328_vm15, %v368_v29 }
  0x90   :  { %325 = vmatmul.msk.bf16.gmra.mxu2 %vm324_vm1, %v368_v29 }
  0x94   :  { %v40_v40 = vpop.permute.xlu1 %39 }
  0x95   :  { %vm80_vm2 = vcmp.eq.s32.totalorder %v28_v27, %v40_v40  ;;  %v37_v41 = vpop.permute.xlu0 %36 }
  0x96   :  { %vm79_vm3 = vcmp.eq.s32.totalorder %v28_v27, %v37_v41 }
  0x97   :  { %vm316_vm4 = vmpackc.low %vm80_vm2, %vm79_vm3 }
  0x98   :  { %317 = vmatmul.msk.bf16.gmra.mxu0 %vm316_vm4, %v368_v29 }
  0x9d   :  { %v52_v43 = vpop.permute.xlu0 %51 }
  0x9e   :  { %vm84_vm6 = vcmp.eq.s32.totalorder %v28_v27, %v52_v43 }
  0x9f   :  { %vm320_vm7 = vmpackc.low %vm84_vm6, %vm83_vm5 }
  0xa0   :  { %321 = vmatmul.msk.bf16.gmra.mxu1 %vm320_vm7, %v368_v29 }
  0xe6   :  { %v206_v44 = vpop.f32.mrf.mxu0 }
  0xe7   :  { %246 = vst [vmem:[%s506_s2] sm:$0xff] %v206_v44 }
  0xee   :  { %v208_v45 = vpop.f32.mrf.mxu0 }
  0xef   :  { %247 = vst [vmem:[%s506_s2 + $0x8] sm:$0xff] %v208_v45 }
 0x102   :  { %v236_v46 = vpop.f32.mrf.mxu3 }
 0x103   :  { %v226_v47 = vpop.f32.mrf.mxu2  ;;  %258 = vst [vmem:[%s506_s2 + $0x60] sm:$0xff] %v236_v46 }
 0x104   :  { %254 = vst [vmem:[%s506_s2 + $0x40] sm:$0xff] %v226_v47 }
 0x105   :  { %v216_v48 = vpop.f32.mrf.mxu1 }
 0x106   :  { %250 = vst [vmem:[%s506_s2 + $0x20] sm:$0xff] %v216_v48 }
 0x10a   :  { %v238_v49 = vpop.f32.mrf.mxu3 }
 0x10b   :  { %v228_v50 = vpop.f32.mrf.mxu2  ;;  %259 = vst [vmem:[%s506_s2 + $0x68] sm:$0xff] %v238_v49 }
 0x10c   :  { %255 = vst [vmem:[%s506_s2 + $0x48] sm:$0xff] %v228_v50 }
 0x10d   :  { %v218_v51 = vpop.f32.mrf.mxu1 }
 0x10e   :  { %251 = vst [vmem:[%s506_s2 + $0x28] sm:$0xff] %v218_v51 }
 0x112   :  { %v241_v52 = vpop.f32.mrf.mxu3 }
 0x113   :  { %v231_v53 = vpop.f32.mrf.mxu2  ;;  %260 = vst [vmem:[%s506_s2 + $0x70] sm:$0xff] %v241_v52 }
 0x114   :  { %256 = vst [vmem:[%s506_s2 + $0x50] sm:$0xff] %v231_v53 }
 0x115   :  { %v211_v54 = vpop.f32.mrf.mxu0 }
 0x116   :  { %248 = vst [vmem:[%s506_s2 + $0x10] sm:$0xff] %v211_v54 }
 0x11a   :  { %v243_v55 = vpop.f32.mrf.mxu3 }
 0x11b   :  { %v233_v56 = vpop.f32.mrf.mxu2  ;;  %261 = vst [vmem:[%s506_s2 + $0x78] sm:$0xff] %v243_v55 }
 0x11c   :  { %257 = vst [vmem:[%s506_s2 + $0x58] sm:$0xff] %v233_v56 }
 0x11d   :  { %v213_v57 = vpop.f32.mrf.mxu0  ;;  %v221_v58 = vpop.f32.mrf.mxu1 }
 0x11e   :  { %249 = vst [vmem:[%s506_s2 + $0x18] sm:$0xff] %v213_v57 }
 0x11f   :  { %252 = vst [vmem:[%s506_s2 + $0x30] sm:$0xff] %v221_v58 }
 0x125   :  { %v223_v59 = vpop.f32.mrf.mxu1 }
 0x126   :  { %253 = vst [vmem:[%s506_s2 + $0x38] sm:$0xff] %v223_v59 }

</bundles_post_ra>
